<compile_context>
chip_gen: v7x
topology: tpu7x:2x2x1
jax: 0.10.0
libtpu: 0.0.40
codegen_flags: <defaults>
</compile_context>

<pallas_src>
import functools

import jax
import jax.numpy as jnp
from jax.experimental import pallas as pl
from jax.experimental.pallas import tpu as pltpu

CLAMP_LB = 1e-40
CLAMP_UB = 1.0

# -log(1e-40): exact PyTorch value at the clamp floor. Used instead of taking
# log() of a denormal constant (which the TPU VPU would flush to 0 -> inf).
_NEG_LOG_LB = 92.10340371976184
_TINY_NORMAL = 1.1754944e-38  # smallest normal float32

LANES = 128


def _masked_nll(x, row_offset, *, total):
    """-log(clamp(x, CLAMP_LB, CLAMP_UB)), with out-of-range elements zeroed."""
    rows, lanes = x.shape
    x = x.astype(jnp.float32)
    r = jax.lax.broadcasted_iota(jnp.int32, (rows, lanes), 0)
    l = jax.lax.broadcasted_iota(jnp.int32, (rows, lanes), 1)
    elem = (row_offset + r) * lanes + l
    valid = elem < total
    # Clamp the log() argument to the smallest normal f32 (denormals flush to
    # zero on the VPU); elements at/below the 1e-40 floor get the exact
    # PyTorch clamp-floor value through the precomputed constant.
    safe = jnp.clip(x, _TINY_NORMAL, CLAMP_UB)
    nll = jnp.where(x <= CLAMP_LB, jnp.float32(_NEG_LOG_LB), -jnp.log(safe))
    return jnp.where(valid, nll, 0.0)


def _gloss_single_kernel(x_ref, o_ref, *, total):
    # Whole input in one block: one DMA, one reduce, no accumulator round trip.
    nll = _masked_nll(x_ref[...], 0, total=total)
    o_ref[...] = (jnp.sum(nll) * (1.0 / total)).reshape(1, 1)


def _gloss_multi_kernel(x_ref, o_ref, acc_ref, *, total, block_rows):
    step = pl.program_id(0)

    @pl.when(step == 0)
    def _init():
        acc_ref[...] = jnp.zeros_like(acc_ref)

    # Elementwise (VPU-only) accumulation per tile; the cross-lane/sublane
    # reduce through the XLU happens only once, in the finalize phase.
    acc_ref[...] += _masked_nll(x_ref[...], step * block_rows, total=total)

    @pl.when(step == pl.num_programs(0) - 1)
    def _finalize():
        o_ref[...] = (jnp.sum(acc_ref[...]) * (1.0 / total)).reshape(1, 1)


def g_loss(logits_gen, *, tile_rows=512):
    """Returns scalar mean(-log(clamp(logits_gen, 1e-40, 1.0))) as float32."""
    total = logits_gen.size
    flat = logits_gen.reshape(-1)

    n_rows = pl.cdiv(total, LANES)
    pad = n_rows * LANES - total
    if pad > 0:
        # Only the <128-element lane tail is padded (values are masked out
        # inside the kernel, so the pad value is irrelevant).
        flat = jnp.pad(flat, (0, pad), constant_values=1)
    x2d = flat.reshape(n_rows, LANES)

    if n_rows <= tile_rows:
        # Single grid step: block covers the whole (padded) array.
        out = pl.pallas_call(
            functools.partial(_gloss_single_kernel, total=total),
            out_shape=jax.ShapeDtypeStruct((1, 1), jnp.float32),
            grid_spec=pltpu.PrefetchScalarGridSpec(
                num_scalar_prefetch=0,
                grid=(1,),
                in_specs=[pl.BlockSpec((n_rows, LANES), lambda i: (0, 0))],
                out_specs=pl.BlockSpec((1, 1), lambda i: (0, 0)),
            ),
            compiler_params=pltpu.CompilerParams(
                dimension_semantics=("arbitrary",)),
        )(x2d)
    else:
        # TODO(synk): on v7x a leading "parallel" core axis could shard the
        # reduction across both TensorCores; omitted for simplicity.
        n_tiles = pl.cdiv(n_rows, tile_rows)
        out = pl.pallas_call(
            functools.partial(_gloss_multi_kernel, total=total,
                              block_rows=tile_rows),
            out_shape=jax.ShapeDtypeStruct((1, 1), jnp.float32),
            grid_spec=pltpu.PrefetchScalarGridSpec(
                num_scalar_prefetch=0,
                grid=(n_tiles,),
                in_specs=[pl.BlockSpec((tile_rows, LANES), lambda i: (i, 0))],
                out_specs=pl.BlockSpec((1, 1), lambda i: (0, 0)),
                scratch_shapes=[pltpu.VMEM((tile_rows, LANES), jnp.float32)],
            ),
            compiler_params=pltpu.CompilerParams(
                dimension_semantics=("arbitrary",)),
        )(x2d)
    return out[0, 0]


def g_loss_ref(logits_gen):
    x = jnp.clip(logits_gen.astype(jnp.float32), CLAMP_LB, CLAMP_UB)
    return jnp.mean(-jnp.log(x))


if __name__ == "__main__":
    key = jax.random.PRNGKey(0)
    # logits_gen: discriminator sigmoid outputs on generated data, in (0, 1).
    x = jax.random.uniform(key, (2, 4, 16, 16), dtype=jnp.float32,
                           minval=0.05, maxval=0.95)

    loss = jax.block_until_ready(g_loss(x))
    ref = jax.block_until_ready(g_loss_ref(x))
    assert jnp.allclose(loss, ref, rtol=1e-4, atol=1e-6), (loss, ref)

    # Also exercise the multi-tile (grid > 1) path with a ragged lane tail.
    x2 = jax.random.uniform(jax.random.PRNGKey(1), (3, 5, 70, 100),
                            dtype=jnp.float32, minval=0.05, maxval=0.95)
    loss2 = jax.block_until_ready(g_loss(x2))
    ref2 = jax.block_until_ready(g_loss_ref(x2))
    assert jnp.allclose(loss2, ref2, rtol=1e-4, atol=1e-6), (loss2, ref2)

    print("KERNEL_OK")
</pallas_src>

<mosaic_0001>
module attributes {stable_mosaic.version = 11 : i64} {
  func.func @_gloss_single_kernel(%arg0: i32, %arg1: memref<16x128xf32, #tpu.memory_space<vmem>>, %arg2: memref<1x1xf32, #tpu.memory_space<vmem>>) attributes {dimension_semantics = [#tpu.dimension_semantics<arbitrary>], iteration_bounds = array<i64: 1>, scalar_prefetch = 0 : i64, scratch_operands = 0 : i64, tpu.core_type = #tpu.core_type<tc>, window_params = [{pipeline_mode = #tpu.pipeline_mode<synchronous>, transform_indices = @transform_0, window_bounds = array<i64: 16, 128>}, {pipeline_mode = #tpu.pipeline_mode<synchronous>, transform_indices = @transform_1, window_bounds = array<i64: 1, 1>}]} {
    %c0 = arith.constant 0 : index
    %c0_0 = arith.constant 0 : index
    %0 = vector.load %arg1[%c0, %c0_0] : memref<16x128xf32, #tpu.memory_space<vmem>>, vector<16x128xf32>
    %1 = tpu.iota {dimensions = array<i32: 0>} : vector<16x128xi32>
    %2 = tpu.iota {dimensions = array<i32: 1>} : vector<16x128xi32>
    %c0_i32 = arith.constant 0 : i32
    %3 = vector.broadcast %c0_i32 : i32 to vector<16x128xi32>
    %4 = arith.addi %3, %1 : vector<16x128xi32>
    %c128_i32 = arith.constant 128 : i32
    %5 = vector.broadcast %c128_i32 : i32 to vector<16x128xi32>
    %6 = arith.muli %4, %5 : vector<16x128xi32>
    %7 = arith.addi %6, %2 : vector<16x128xi32>
    %c2048_i32 = arith.constant 2048 : i32
    %8 = vector.broadcast %c2048_i32 : i32 to vector<16x128xi32>
    %9 = arith.cmpi slt, %7, %8 : vector<16x128xi32>
    %cst = arith.constant 1.17549435E-38 : f32
    %cst_1 = arith.constant 1.000000e+00 : f32
    %10 = vector.broadcast %cst : f32 to vector<16x128xf32>
    %11 = arith.maximumf %10, %0 : vector<16x128xf32>
    %12 = vector.broadcast %cst_1 : f32 to vector<16x128xf32>
    %13 = arith.minimumf %12, %11 : vector<16x128xf32>
    %cst_2 = arith.constant 9.999940e-41 : f32
    %14 = vector.broadcast %cst_2 : f32 to vector<16x128xf32>
    %15 = arith.cmpf ole, %0, %14 : vector<16x128xf32>
    %16 = math.log %13 : vector<16x128xf32>
    %cst_3 = arith.constant 0.000000e+00 : f32
    %17 = vector.broadcast %cst_3 : f32 to vector<16x128xf32>
    %18 = arith.subf %17, %16 : vector<16x128xf32>
    %cst_4 = arith.constant 9.210340e+01 : f32
    %19 = vector.broadcast %cst_4 : f32 to vector<16x128xf32>
    %20 = arith.select %15, %19, %18 : vector<16x128xi1>, vector<16x128xf32>
    %cst_5 = arith.constant 0.000000e+00 : f32
    %21 = vector.broadcast %cst_5 : f32 to vector<16x128xf32>
    %22 = arith.select %9, %20, %21 : vector<16x128xi1>, vector<16x128xf32>
    %23 = vector.shape_cast %22 : vector<16x128xf32> to vector<1x16x128xf32>
    %cst_6 = arith.constant dense<0.000000e+00> : vector<1xf32>
    %24 = vector.multi_reduction <add>, %23, %cst_6 [1, 2] : vector<1x16x128xf32> to vector<1xf32>
    %25 = vector.shape_cast %24 : vector<1xf32> to vector<1x1x1xf32>
    %26 = vector.extract %25[0, 0, 0] : f32 from vector<1x1x1xf32>
    %cst_7 = arith.constant 4.8828125E-4 : f32
    %27 = arith.mulf %26, %cst_7 : f32
    %28 = vector.broadcast %27 : f32 to vector<1x1xf32>
    %c0_8 = arith.constant 0 : index
    %c0_9 = arith.constant 0 : index
    %29 = vector.load %arg2[%c0_8, %c0_9] : memref<1x1xf32, #tpu.memory_space<vmem>>, vector<1x1xf32>
    tpu.vector_store %arg2[%c0_8, %c0_9], %28 {strides = array<i32>} : memref<1x1xf32, #tpu.memory_space<vmem>>, vector<1x1xf32>,
    return
  }
  func.func @transform_0(%arg0: i32) -> (i32, i32) {
    %c0_i32 = arith.constant 0 : i32
    %c0_i32_0 = arith.constant 0 : i32
    %c0_i32_1 = arith.constant 0 : i32
    return %c0_i32, %c0_i32_0 : i32, i32
  }
  func.func @transform_1(%arg0: i32) -> (i32, i32) {
    %c0_i32 = arith.constant 0 : i32
    %c0_i32_0 = arith.constant 0 : i32
    %c0_i32_1 = arith.constant 0 : i32
    return %c0_i32, %c0_i32_0 : i32, i32
  }
}

</mosaic_0001>

<bundles_post_ra>
// kernel: tpu_custom_call.1
= control target key start
LH: loop header
LB: loop body
LE: loop exit
PB: predicated region body
PF: predicated region fallthrough
CT: control target
= control target key end

     0   :  { %6 = vsyncpa [#allocation3], 0  ;;  %s177_s0 = inlined_call_operand.hbm [shape: f32[16,128], index: 0, kind: input, shape index: {}]   ;;  %s178_s1 = inlined_call_operand.hbm [shape: f32[1,1], index: 1, kind: output, shape index: {}]  }
   0x1   :  { %7 = vsyncpa [#allocation4], 0  ;;  %s139_s6 = smov [#allocation2]   ;;  %s91_s10 = scalar_lea.hbm %s177_s0, 256 }
   0x2   :  { %s13_s7 = sshll.u32 %s139_s6, 4  ;;  %p92_p0 = scmp.ne.s32.totalorder %s177_s0, %s91_s10  ;;  %s14_s7 = int_to_ptr.vmem [resolvable:$true] %s13_s7 }
   0x3   :  { %p95_p1 = scmp.lt.u32.totalorder %s91_s10, %s177_s0 }
   0x5   :  { %p97_p2 = pnand %p95_p1, %p92_p0 }
   0x7   :  { %100 = shalt.err (!%p97_p2)
}
   0x8   :  { %s101_s15 = scalar_lea.vmem %s14_s7, 256  ;;  %p106_p4 = scmp.lt.s32.totalorder %s14_s7, %s14_s7 }
   0x9   :  { %p102_p3 = scmp.ne.s32.totalorder %s14_s7, %s101_s15  ;;  %p107_p5 = scmp.lt.s32.totalorder %s101_s15, %s101_s15 }
   0xb   :  { %p108_p6 = por %p107_p5, %p106_p4 }
   0xd   :  { %p109_p7 = pnand %p108_p6, %p102_p3 }
   0xf   :  { %112 = shalt.err (!%p109_p7)
}
  0x10   :  { %s140_s16 = smov 128   ;;  %s141_s17 = smov 8  }
  0x11   :  { %19 = dma.hbm_to_vmem [thread:$0]  %s177_s0, 256, %s14_s7, [#allocation3], %s140_s16, %s140_s16, %s141_s17  }
  0x12   :  { %135 = dma.done.wait [#allocation3], 256  }
  0x13   :  { %136 = vsyncadd [#allocation3], 4294967040  ;;  %v25_v0 = vlaneseq  ;;  %v23_v1 = vld [vmem:[#allocation2] sm:$0xff]  ;;  %v24_v2 = vld [vmem:[#allocation2 + $0x8] sm:$0xff]  ;;  %s142_s0 = smov [#allocation5]   ;;  %vm64_vm4 = vcmask 0  }
  0x14   :  { %v36_v3 = vmax.f32 %v23_v1, 1.1754944e-38  ;;  %v37_v4 = vmax.f32 %v24_v2, 1.1754944e-38  ;;  %vm40_vm0 = vcmp.le.f32.partialorder %v23_v1, 1e-40  ;;  %vm41_vm2 = vcmp.le.f32.partialorder %v24_v2, 1e-40  ;;  %s72_s20 = sshll.u32 %s142_s0, 4  ;;  %s73_s20 = int_to_ptr.vmem [resolvable:$true] %s72_s20 }
  0x15   :  { %v26_v5 = vshrl.u32 %v25_v0, 7  ;;  %v29_v9 = vand.u32 127, %v25_v0  ;;  %s113_s23 = scalar_lea.vmem %s73_s20, 16  ;;  %s117_s24 = scalar_lea.vmem %s73_s20, 32 }
  0x16   :  { %v38_v6 = vmin.f32 %v36_v3, 1.0  ;;  %v39_v7 = vmin.f32 %v37_v4, 1.0  ;;  %p114_p8 = scmp.ne.s32.totalorder %s73_s20, %s113_s23  ;;  %p118_p9 = scmp.lt.s32.totalorder %s73_s20, %s73_s20 }
  0x17   :  { %v27_v8 = vadd.s32 8, %v26_v5  ;;  %v30_v10 = vmul.u32 128, %v26_v5  ;;  %p119_p10 = scmp.lt.s32.totalorder %s117_s24, %s113_s23 }
  0x18   :  { %87 = vlog2.f32 %v38_v6 }
  0x19   :  { %89 = vlog2.f32 %v39_v7  ;;  %v31_v11 = vmul.u32 128, %v27_v8  ;;  %v32_v12 = vadd.s32 %v30_v10, %v29_v9  ;;  %p120_p11 = por %p119_p10, %p118_p9 }
  0x1b   :  { %v33_v14 = vadd.s32 %v31_v11, %v29_v9  ;;  %vm34_vm1 = vcmp.lt.s32.totalorder %v32_v12, 2048  ;;  %p121_p12 = pnand %p120_p11, %p114_p8 }
  0x1d   :  { %vm35_vm3 = vcmp.lt.s32.totalorder %v33_v14, 2048 }
  0x22   :  { %v88_v13 = vpop.eup %87 }
  0x23   :  { %v90_v15 = vpop.eup %89  ;;  %v43_v16 = vmul.f32 0.6931472, %v88_v13 }
  0x24   :  { %v45_v17 = vmul.f32 0.6931472, %v90_v15 }
  0x25   :  { %v46_v18 = vsub.f32 0.0, %v43_v16 }
  0x26   :  { %v47_v19 = vsub.f32 0.0, %v45_v17 }
  0x27   :  { %v48_v20 = vsel %vm40_vm0, 92.1034, %v46_v18 }
  0x28   :  { %v49_v21 = vsel %vm41_vm2, 92.1034, %v47_v19  ;;  %v50_v22 = vsel %vm34_vm1, %v48_v20, 0.0 }
  0x29   :  { %v51_v23 = vsel %vm35_vm3, %v49_v21, 0.0 }
  0x2a   :  { %v52_v24 = vadd.f32 %v51_v23, %v50_v22 }
  0x2c   :  { %53 = vadd.xlane.f32.xlu0 %v52_v24 }
  0xb9   :  { %v54_v25 = vpop.xlane.xlu0 %53 }
  0xba   :  { %v55_v26 = vrot.slane %v54_v25, 4 }
  0xbc   :  { %v56_v27 = vadd.f32 %v55_v26, %v54_v25 }
  0xbe   :  { %v57_v28 = vrot.slane %v56_v27, 2 }
  0xc0   :  { %v58_v29 = vadd.f32 %v57_v28, %v56_v27 }
  0xc2   :  { %v59_v30 = vrot.slane %v58_v29, 1 }
  0xc4   :  { %v60_v31 = vadd.f32 %v59_v30, %v58_v29 }
  0xc6   :  { %81 = vpush %v60_v31 }
  0xf7   :  { %s82_s21 = spop %81 }
  0xf8   :  { %s62_s22 = smul.f32 0.00048828125, %s82_s21 }
  0xfa   :  { %v63_v32 = vstv %s62_s22 }
  0xfb   :  { %65 = vst.msk [vmem:[#allocation5] sm:$0x1] %vm64_vm4, %v63_v32 }
  0xfc   :  { %124 = shalt.err (!%p121_p12)
}
  0xfd   :  { %s125_s27 = scalar_lea.hbm %s178_s1, 16 }
  0xfe   :  { %p126_p13 = scmp.ne.s32.totalorder %s178_s1, %s125_s27  ;;  %p129_p0 = scmp.lt.u32.totalorder %s125_s27, %s178_s1 }
 0x100   :  { %p131_p1 = pnand %p129_p0, %p126_p13 }
 0x102   :  { %134 = shalt.err (!%p131_p1)
}
 0x103   :  { %75 = dma.vmem_to_hbm [thread:$0]  %s73_s20, 16, %s178_s1, [#allocation4]  }
 0x104   :  { %137 = dma.done.wait [#allocation4], 16  }
 0x105   :  { %138 = vsyncadd [#allocation4], 4294967280 }
 0x106   :  { %79 = vsyncpa [#allocation3], 1 }
 0x107   :  { %80 = vsyncpa [#allocation4], 1 }

</bundles_post_ra>
